<compile_context>
chip_gen: v7x
topology: tpu7x:2x2x1
jax: 0.10.0
libtpu: 0.0.40
codegen_flags: <defaults>
</compile_context>

<pallas_src>
import functools

import jax
import jax.numpy as jnp
from jax import lax
from jax.experimental import pallas as pl
from jax.experimental.pallas import tpu as pltpu

GROUPS = 12      # nn.GroupNorm(12, channels)
EPS = 1e-5       # GroupNorm default eps


def _ela_kernel(x_ref, w_ref, b_ref, gamma_ref, beta_ref, grp_ref,
                seg_ref, exph_ref, expw_ref, o_ref, *,
                H, W, cg, chunk, n_chunks):
    """Fused ELA forward for one batch element, lane-dense (C, H*W) layout.

    x_ref:     (1, C, HW)  activation block (HW = H*W on the 128-lane axis)
    w_ref:     (C, C)      Conv1d 1x1 weight (out_ch, in_ch)
    b_ref:     (C, 1)      Conv1d bias
    gamma_ref: (C, 1)      GroupNorm weight
    beta_ref:  (C, 1)      GroupNorm bias
    grp_ref:   (C, C)      grp[i, j] = 1.0 iff channels i, j share a group
    seg_ref:   (HW, H+W)   [:, :H] = 1/W segment-sum (pool over W); [:, H:] = 1/H (pool over H)
    exph_ref:  (H, HW)     0/1 broadcast-back matrix: exph[h, h*W + w] = 1
    expw_ref:  (W, HW)     0/1 broadcast-back matrix: expw[w, h*W + w] = 1
    o_ref:     (1, C, HW)  output block
    """
    C = x_ref.shape[1]

    # ---- Phase 1: pooled = [mean_W(x) | mean_H(x)]  -> (C, H+W) ---------------
    # Chunked over the lane axis so the big block is never live all at once; the
    # segment-sum runs on the otherwise-idle MXU (loads stay fully lane-dense).
    def pool_body(i, acc):
        c0 = pl.multiple_of(i * chunk, chunk)
        xc = x_ref[0, :, pl.ds(c0, chunk)].astype(jnp.float32)          # (C, chunk)
        sc = seg_ref[pl.ds(c0, chunk), :]                               # (chunk, H+W)
        return acc + jnp.dot(xc, sc, preferred_element_type=jnp.float32)

    pooled = lax.fori_loop(0, n_chunks, pool_body,
                           jnp.zeros((C, H + W), jnp.float32))

    # ---- Phase 2: fused Conv1d(1x1) + GroupNorm(12) + Sigmoid on (C, H+W) -----
    w = w_ref[...]
    grp = grp_ref[...]
    y = jnp.dot(w, pooled, preferred_element_type=jnp.float32) + b_ref[...]  # (C, H+W)
    y_h = y[:, :H]                                                           # (C, H)
    y_w = y[:, H:]                                                           # (C, W)

    inv_nh = 1.0 / (cg * H)
    inv_nw = 1.0 / (cg * W)
    # Per-channel sums for both branches fused into one (C, 2) RHS, then a single
    # (C,C)x(C,2) dot produces both branches' group means (same again for vars).
    sums = jnp.concatenate(
        [jnp.sum(y_h, axis=1, keepdims=True) * inv_nh,
         jnp.sum(y_w, axis=1, keepdims=True) * inv_nw], axis=1)             # (C, 2)
    mean = jnp.dot(grp, sums, preferred_element_type=jnp.float32)           # (C, 2)
    cen_h = y_h - mean[:, 0:1]
    cen_w = y_w - mean[:, 1:2]
    sqs = jnp.concatenate(
        [jnp.sum(cen_h * cen_h, axis=1, keepdims=True) * inv_nh,
         jnp.sum(cen_w * cen_w, axis=1, keepdims=True) * inv_nw], axis=1)   # (C, 2)
    var = jnp.dot(grp, sqs, preferred_element_type=jnp.float32)             # (C, 2) biased var
    rstd = lax.rsqrt(var + EPS)

    gamma = gamma_ref[...]
    beta = beta_ref[...]
    # Sigmoid: exp() goes to the EUP; the divide acts on a tiny (C, H+W) array so the
    # exact form is off the big-data path (approx reciprocal would only add error).
    a_h = 1.0 / (1.0 + jnp.exp(-(cen_h * rstd[:, 0:1] * gamma + beta)))     # (C, H)
    a_w = 1.0 / (1.0 + jnp.exp(-(cen_w * rstd[:, 1:2] * gamma + beta)))     # (C, W)

    # ---- Phase 3: out = x * a_h[broadcast over W] * a_w[broadcast over H] -----
    # Chunked re-reads of x_ref bound vreg live ranges; the broadcast-back of the
    # attention vectors to (C, chunk) is a tiny MXU dot against a 0/1 matrix, so the
    # stores stay lane-dense and the VPU only does the two elementwise multiplies.
    def mod_body(i, carry):
        c0 = pl.multiple_of(i * chunk, chunk)
        ah_e = jnp.dot(a_h, exph_ref[:, pl.ds(c0, chunk)],
                       preferred_element_type=jnp.float32)                  # (C, chunk)
        aw_e = jnp.dot(a_w, expw_ref[:, pl.ds(c0, chunk)],
                       preferred_element_type=jnp.float32)                  # (C, chunk)
        xc = x_ref[0, :, pl.ds(c0, chunk)].astype(jnp.float32)
        o_ref[0, :, pl.ds(c0, chunk)] = (xc * ah_e * aw_e).astype(o_ref.dtype)
        return carry

    lax.fori_loop(0, n_chunks, mod_body, 0)


def ela_forward(x, conv_w, conv_b, gn_gamma, gn_beta, *,
                groups=GROUPS, chunk_lanes=1024):
    """ELA forward. x: (B, C, H, W) NCHW; conv_w: (C, C, 1); conv_b/gn_*: (C,)."""
    B, C, H, W = x.shape
    assert C % groups == 0, "GroupNorm(12, C) requires C % 12 == 0"
    HW = H * W

    # Lane-dense view of the activations: free, contiguous reinterpretation of HBM.
    x2 = x.reshape(B, C, HW)

    # In-kernel lane-chunk: largest power-of-two multiple of 128 dividing HW and not
    # exceeding chunk_lanes; otherwise a single full-width chunk.
    chunk_lanes = max(128, int(chunk_lanes))
    if HW % 128 == 0:
        chunk = 128
        while chunk * 2 <= min(chunk_lanes, HW) and HW % (chunk * 2) == 0:
            chunk *= 2
    else:
        chunk = HW
    n_chunks = HW // chunk

    # Parameters / constants (VMEM-resident across grid steps, constant index maps).
    w_mat = conv_w.reshape(C, C).astype(jnp.float32)
    b_vec = conv_b.reshape(C, 1).astype(jnp.float32)
    gamma = gn_gamma.reshape(C, 1).astype(jnp.float32)
    beta = gn_beta.reshape(C, 1).astype(jnp.float32)
    gid = jnp.arange(C) // (C // groups)
    grp = (gid[:, None] == gid[None, :]).astype(jnp.float32)                 # (C, C)

    # Segment-sum (pooling) and broadcast-back matrices for the flattened HW axis.
    h_of = jnp.arange(HW, dtype=jnp.int32) // W
    w_of = jnp.arange(HW, dtype=jnp.int32) % W
    onehot_h = (h_of[:, None] == jnp.arange(H)[None, :]).astype(jnp.float32)  # (HW, H)
    onehot_w = (w_of[:, None] == jnp.arange(W)[None, :]).astype(jnp.float32)  # (HW, W)
    seg = jnp.concatenate([onehot_h / W, onehot_w / H], axis=1)               # (HW, H+W)
    exp_h = onehot_h.T                                                        # (H, HW)
    exp_w = onehot_w.T                                                        # (W, HW)

    # Explicit VMEM budget: double-buffered in/out blocks + resident constants + headroom.
    itemsize = jnp.dtype(x.dtype).itemsize
    block_bytes = C * HW * itemsize
    const_bytes = 4 * (2 * HW * (H + W) + 2 * C * C + 3 * C)
    vmem_needed = 4 * block_bytes + 2 * const_bytes + (8 << 20)
    try:
        vmem_cap = pltpu.get_tpu_info().vmem_capacity_bytes
    except Exception:
        vmem_cap = 64 << 20   # v7x per-core physical VMEM (smallest of the fleet)
    vmem_limit = int(min(max(vmem_needed, 32 << 20), vmem_cap))
    # TODO(synk): when 4*block_bytes exceeds per-core VMEM (v7x = 64 MiB), switch to a
    # two-phase (B, 2, H-tile) grid that accumulates pooled sums in scratch and
    # re-reads x tile-by-tile for the modulate phase.

    cost = pl.CostEstimate(
        flops=B * (4 * C * HW * (H + W) + 2 * C * C * (H + W) + 8 * C * C + 3 * C * HW),
        transcendentals=B * C * (H + W),
        bytes_accessed=2 * B * C * HW * itemsize + const_bytes,
    )

    kernel = functools.partial(
        _ela_kernel, H=H, W=W, cg=C // groups, chunk=chunk, n_chunks=n_chunks)

    out = pl.pallas_call(
        kernel,
        out_shape=jax.ShapeDtypeStruct((B, C, HW), x.dtype),
        grid=(B,),
        in_specs=[
            pl.BlockSpec((1, C, HW), lambda b: (b, 0, 0)),      # activations (per-batch tile)
            pl.BlockSpec((C, C), lambda b: (0, 0)),             # conv weight
            pl.BlockSpec((C, 1), lambda b: (0, 0)),             # conv bias
            pl.BlockSpec((C, 1), lambda b: (0, 0)),             # GN gamma
            pl.BlockSpec((C, 1), lambda b: (0, 0)),             # GN beta
            pl.BlockSpec((C, C), lambda b: (0, 0)),             # same-group matrix
            pl.BlockSpec((HW, H + W), lambda b: (0, 0)),        # pooling segment-sum matrix
            pl.BlockSpec((H, HW), lambda b: (0, 0)),            # broadcast-back (rows)
            pl.BlockSpec((W, HW), lambda b: (0, 0)),            # broadcast-back (cols)
        ],
        out_specs=pl.BlockSpec((1, C, HW), lambda b: (b, 0, 0)),
        compiler_params=pltpu.CompilerParams(
            dimension_semantics=("parallel",),                  # megacore sharding on v7x
            vmem_limit_bytes=vmem_limit,
        ),
        cost_estimate=cost,
    )(x2, w_mat, b_vec, gamma, beta, grp, seg, exp_h, exp_w)

    return out.reshape(B, C, H, W)


def _ela_reference(x, conv_w, conv_b, gn_gamma, gn_beta, groups=GROUPS, eps=EPS):
    """Plain-JAX reference mirroring the PyTorch ELA forward."""
    B, C, H, W = x.shape
    w = conv_w.reshape(C, C)

    def branch(p):  # p: (B, C, L)
        L = p.shape[-1]
        y = jnp.einsum("oc,bcl->bol", w, p) + conv_b[None, :, None]
        yg = y.reshape(B, groups, C // groups, L)
        mean = jnp.mean(yg, axis=(2, 3), keepdims=True)
        var = jnp.mean((yg - mean) ** 2, axis=(2, 3), keepdims=True)
        yn = ((yg - mean) / jnp.sqrt(var + eps)).reshape(B, C, L)
        yn = yn * gn_gamma[None, :, None] + gn_beta[None, :, None]
        return jax.nn.sigmoid(yn)

    a_h = branch(jnp.mean(x, axis=3))  # (B, C, H)
    a_w = branch(jnp.mean(x, axis=2))  # (B, C, W)
    return x * a_h[:, :, :, None] * a_w[:, :, None, :]


if __name__ == "__main__":
    key = jax.random.PRNGKey(0)
    kx, kw, kb, kg, kbt = jax.random.split(key, 5)

    # channels must be divisible by 12 (GroupNorm(12, channels) in the module)
    B, C, H, W = 2, 24, 16, 32

    x = jax.random.normal(kx, (B, C, H, W), dtype=jnp.float32)
    conv_w = jax.random.normal(kw, (C, C, 1), dtype=jnp.float32) * 0.1   # Conv1d weight
    conv_b = jax.random.normal(kb, (C,), dtype=jnp.float32) * 0.1
    gn_gamma = 1.0 + 0.1 * jax.random.normal(kg, (C,), dtype=jnp.float32)
    gn_beta = 0.1 * jax.random.normal(kbt, (C,), dtype=jnp.float32)

    # chunk_lanes=256 -> HW=512 is processed in two 256-lane chunks, exercising the
    # chunked (bounded-live-range) path at this small test shape.
    out = ela_forward(x, conv_w, conv_b, gn_gamma, gn_beta, chunk_lanes=256)
    out = jax.block_until_ready(out)

    ref = _ela_reference(x, conv_w, conv_b, gn_gamma, gn_beta)
    assert out.shape == (B, C, H, W)
    max_err = float(jnp.max(jnp.abs(out - ref)))
    assert max_err < 1e-3, f"max_err={max_err}"

    print("KERNEL_OK")
</pallas_src>

<mosaic_0001>
module attributes {stable_mosaic.version = 11 : i64} {
  func.func @_ela_kernel(%arg0: i32, %arg1: memref<1x24x512xf32, #tpu.memory_space<vmem>>, %arg2: memref<24x24xf32, #tpu.memory_space<vmem>>, %arg3: memref<24x1xf32, #tpu.memory_space<vmem>>, %arg4: memref<24x1xf32, #tpu.memory_space<vmem>>, %arg5: memref<24x1xf32, #tpu.memory_space<vmem>>, %arg6: memref<24x24xf32, #tpu.memory_space<vmem>>, %arg7: memref<512x48xf32, #tpu.memory_space<vmem>>, %arg8: memref<16x512xf32, #tpu.memory_space<vmem>>, %arg9: memref<32x512xf32, #tpu.memory_space<vmem>>, %arg10: memref<1x24x512xf32, #tpu.memory_space<vmem>>) attributes {dimension_semantics = [#tpu.dimension_semantics<parallel>], iteration_bounds = array<i64: 2>, scalar_prefetch = 0 : i64, scratch_operands = 0 : i64, tpu.core_type = #tpu.core_type<tc>, window_params = [{transform_indices = @transform_0, window_bounds = array<i64: 1, 24, 512>}, {pipeline_mode = #tpu.pipeline_mode<synchronous>, transform_indices = @transform_1, window_bounds = array<i64: 24, 24>}, {pipeline_mode = #tpu.pipeline_mode<synchronous>, transform_indices = @transform_2, window_bounds = array<i64: 24, 1>}, {pipeline_mode = #tpu.pipeline_mode<synchronous>, transform_indices = @transform_3, window_bounds = array<i64: 24, 1>}, {pipeline_mode = #tpu.pipeline_mode<synchronous>, transform_indices = @transform_4, window_bounds = array<i64: 24, 1>}, {pipeline_mode = #tpu.pipeline_mode<synchronous>, transform_indices = @transform_5, window_bounds = array<i64: 24, 24>}, {pipeline_mode = #tpu.pipeline_mode<synchronous>, transform_indices = @transform_6, window_bounds = array<i64: 512, 48>}, {pipeline_mode = #tpu.pipeline_mode<synchronous>, transform_indices = @transform_7, window_bounds = array<i64: 16, 512>}, {pipeline_mode = #tpu.pipeline_mode<synchronous>, transform_indices = @transform_8, window_bounds = array<i64: 32, 512>}, {transform_indices = @transform_9, window_bounds = array<i64: 1, 24, 512>}]} {
    %cst = arith.constant 0.000000e+00 : f32
    %0 = vector.broadcast %cst : f32 to vector<24x48xf32>
    %c0_i32 = arith.constant 0 : i32
    %c2_i32 = arith.constant 2 : i32
    %1 = arith.addi %c0_i32, %c2_i32 : i32
    %c1_i32 = arith.constant 1 : i32
    %2 = scf.for %arg11 = %c0_i32 to %1 step %c1_i32 iter_args(%arg12 = %0) -> (vector<24x48xf32>)  : i32 {
      %c256_i32 = arith.constant 256 : i32
      %73 = arith.muli %arg11, %c256_i32 : i32
      %74 = tpu.assume_multiple %73, 256 : i32
      %c0_32 = arith.constant 0 : index
      %c0_33 = arith.constant 0 : index
      %75 = arith.index_cast %74 : i32 to index
      %76 = vector.load %arg1[%c0_32, %c0_33, %75] : memref<1x24x512xf32, #tpu.memory_space<vmem>>, vector<1x24x256xf32>
      %77 = vector.shape_cast %76 : vector<1x24x256xf32> to vector<24x256xf32>
      %78 = arith.index_cast %74 : i32 to index
      %c0_34 = arith.constant 0 : index
      %79 = vector.load %arg7[%78, %c0_34] : memref<512x48xf32, #tpu.memory_space<vmem>>, vector<256x48xf32>
      %cst_35 = arith.constant dense<0.000000e+00> : vector<24x48xf32>
      %80 = tpu.matmul %77, %79, %cst_35 {dimension_numbers = #tpu.dot_dimension_numbers<[1], [0], [0], [1], [0, 0, 1, 1], [], []>} : vector<24x256xf32>, vector<256x48xf32>, vector<24x48xf32> -> vector<24x48xf32>
      %81 = arith.addf %arg12, %80 : vector<24x48xf32>
      scf.yield %81 : vector<24x48xf32>
    }
    %c2_i32_0 = arith.constant 2 : i32
    %c0 = arith.constant 0 : index
    %c0_1 = arith.constant 0 : index
    %3 = vector.load %arg2[%c0, %c0_1] : memref<24x24xf32, #tpu.memory_space<vmem>>, vector<24x24xf32>
    %c0_2 = arith.constant 0 : index
    %c0_3 = arith.constant 0 : index
    %4 = vector.load %arg6[%c0_2, %c0_3] : memref<24x24xf32, #tpu.memory_space<vmem>>, vector<24x24xf32>
    %cst_4 = arith.constant dense<0.000000e+00> : vector<24x48xf32>
    %5 = tpu.matmul %3, %2, %cst_4 {dimension_numbers = #tpu.dot_dimension_numbers<[1], [0], [0], [1], [0, 0, 1, 1], [], []>} : vector<24x24xf32>, vector<24x48xf32>, vector<24x48xf32> -> vector<24x48xf32>
    %c0_5 = arith.constant 0 : index
    %c0_6 = arith.constant 0 : index
    %6 = vector.load %arg3[%c0_5, %c0_6] : memref<24x1xf32, #tpu.memory_space<vmem>>, vector<24x1xf32>
    %7 = vector.broadcast %6 : vector<24x1xf32> to vector<24x48xf32>
    %8 = arith.addf %5, %7 : vector<24x48xf32>
    %9 = vector.extract_strided_slice %8 {offsets = [0, 0], sizes = [24, 16], strides = [1, 1]} : vector<24x48xf32> to vector<24x16xf32>
    %10 = vector.extract_strided_slice %8 {offsets = [0, 16], sizes = [24, 32], strides = [1, 1]} : vector<24x48xf32> to vector<24x32xf32>
    %cst_7 = arith.constant dense<0.000000e+00> : vector<24xf32>
    %11 = vector.multi_reduction <add>, %9, %cst_7 [1] : vector<24x16xf32> to vector<24xf32>
    %12 = vector.shape_cast %11 : vector<24xf32> to vector<24x1xf32>
    %cst_8 = arith.constant 3.125000e-02 : f32
    %13 = vector.broadcast %cst_8 : f32 to vector<24x1xf32>
    %14 = arith.mulf %12, %13 : vector<24x1xf32>
    %cst_9 = arith.constant dense<0.000000e+00> : vector<24xf32>
    %15 = vector.multi_reduction <add>, %10, %cst_9 [1] : vector<24x32xf32> to vector<24xf32>
    %16 = vector.shape_cast %15 : vector<24xf32> to vector<24x1xf32>
    %cst_10 = arith.constant 1.562500e-02 : f32
    %17 = vector.broadcast %cst_10 : f32 to vector<24x1xf32>
    %18 = arith.mulf %16, %17 : vector<24x1xf32>
    %19 = tpu.concatenate %14, %18 in 1 : vector<24x1xf32>, vector<24x1xf32> -> vector<24x2xf32>
    %cst_11 = arith.constant dense<0.000000e+00> : vector<24x2xf32>
    %20 = tpu.matmul %4, %19, %cst_11 {dimension_numbers = #tpu.dot_dimension_numbers<[1], [0], [0], [1], [0, 0, 1, 1], [], []>} : vector<24x24xf32>, vector<24x2xf32>, vector<24x2xf32> -> vector<24x2xf32>
    %21 = vector.extract_strided_slice %20 {offsets = [0, 0], sizes = [24, 1], strides = [1, 1]} : vector<24x2xf32> to vector<24x1xf32>
    %22 = vector.broadcast %21 : vector<24x1xf32> to vector<24x16xf32>
    %23 = arith.subf %9, %22 : vector<24x16xf32>
    %24 = vector.extract_strided_slice %20 {offsets = [0, 1], sizes = [24, 1], strides = [1, 1]} : vector<24x2xf32> to vector<24x1xf32>
    %25 = vector.broadcast %24 : vector<24x1xf32> to vector<24x32xf32>
    %26 = arith.subf %10, %25 : vector<24x32xf32>
    %27 = arith.mulf %23, %23 : vector<24x16xf32>
    %cst_12 = arith.constant dense<0.000000e+00> : vector<24xf32>
    %28 = vector.multi_reduction <add>, %27, %cst_12 [1] : vector<24x16xf32> to vector<24xf32>
    %29 = vector.shape_cast %28 : vector<24xf32> to vector<24x1xf32>
    %cst_13 = arith.constant 3.125000e-02 : f32
    %30 = vector.broadcast %cst_13 : f32 to vector<24x1xf32>
    %31 = arith.mulf %29, %30 : vector<24x1xf32>
    %32 = arith.mulf %26, %26 : vector<24x32xf32>
    %cst_14 = arith.constant dense<0.000000e+00> : vector<24xf32>
    %33 = vector.multi_reduction <add>, %32, %cst_14 [1] : vector<24x32xf32> to vector<24xf32>
    %34 = vector.shape_cast %33 : vector<24xf32> to vector<24x1xf32>
    %cst_15 = arith.constant 1.562500e-02 : f32
    %35 = vector.broadcast %cst_15 : f32 to vector<24x1xf32>
    %36 = arith.mulf %34, %35 : vector<24x1xf32>
    %37 = tpu.concatenate %31, %36 in 1 : vector<24x1xf32>, vector<24x1xf32> -> vector<24x2xf32>
    %cst_16 = arith.constant dense<0.000000e+00> : vector<24x2xf32>
    %38 = tpu.matmul %4, %37, %cst_16 {dimension_numbers = #tpu.dot_dimension_numbers<[1], [0], [0], [1], [0, 0, 1, 1], [], []>} : vector<24x24xf32>, vector<24x2xf32>, vector<24x2xf32> -> vector<24x2xf32>
    %cst_17 = arith.constant 9.99999974E-6 : f32
    %39 = vector.broadcast %cst_17 : f32 to vector<24x2xf32>
    %40 = arith.addf %38, %39 : vector<24x2xf32>
    %41 = math.rsqrt %40 : vector<24x2xf32>
    %c0_18 = arith.constant 0 : index
    %c0_19 = arith.constant 0 : index
    %42 = vector.load %arg4[%c0_18, %c0_19] : memref<24x1xf32, #tpu.memory_space<vmem>>, vector<24x1xf32>
    %c0_20 = arith.constant 0 : index
    %c0_21 = arith.constant 0 : index
    %43 = vector.load %arg5[%c0_20, %c0_21] : memref<24x1xf32, #tpu.memory_space<vmem>>, vector<24x1xf32>
    %44 = vector.extract_strided_slice %41 {offsets = [0, 0], sizes = [24, 1], strides = [1, 1]} : vector<24x2xf32> to vector<24x1xf32>
    %45 = vector.broadcast %44 : vector<24x1xf32> to vector<24x16xf32>
    %46 = arith.mulf %23, %45 : vector<24x16xf32>
    %47 = vector.broadcast %42 : vector<24x1xf32> to vector<24x16xf32>
    %48 = arith.mulf %46, %47 : vector<24x16xf32>
    %49 = vector.broadcast %43 : vector<24x1xf32> to vector<24x16xf32>
    %50 = arith.addf %48, %49 : vector<24x16xf32>
    %cst_22 = arith.constant 0.000000e+00 : f32
    %51 = vector.broadcast %cst_22 : f32 to vector<24x16xf32>
    %52 = arith.subf %51, %50 : vector<24x16xf32>
    %53 = math.exp %52 : vector<24x16xf32>
    %cst_23 = arith.constant 1.000000e+00 : f32
    %54 = vector.broadcast %cst_23 : f32 to vector<24x16xf32>
    %55 = arith.addf %54, %53 : vector<24x16xf32>
    %cst_24 = arith.constant 1.000000e+00 : f32
    %56 = vector.broadcast %cst_24 : f32 to vector<24x16xf32>
    %57 = arith.divf %56, %55 : vector<24x16xf32>
    %58 = vector.extract_strided_slice %41 {offsets = [0, 1], sizes = [24, 1], strides = [1, 1]} : vector<24x2xf32> to vector<24x1xf32>
    %59 = vector.broadcast %58 : vector<24x1xf32> to vector<24x32xf32>
    %60 = arith.mulf %26, %59 : vector<24x32xf32>
    %61 = vector.broadcast %42 : vector<24x1xf32> to vector<24x32xf32>
    %62 = arith.mulf %60, %61 : vector<24x32xf32>
    %63 = vector.broadcast %43 : vector<24x1xf32> to vector<24x32xf32>
    %64 = arith.addf %62, %63 : vector<24x32xf32>
    %cst_25 = arith.constant 0.000000e+00 : f32
    %65 = vector.broadcast %cst_25 : f32 to vector<24x32xf32>
    %66 = arith.subf %65, %64 : vector<24x32xf32>
    %67 = math.exp %66 : vector<24x32xf32>
    %cst_26 = arith.constant 1.000000e+00 : f32
    %68 = vector.broadcast %cst_26 : f32 to vector<24x32xf32>
    %69 = arith.addf %68, %67 : vector<24x32xf32>
    %cst_27 = arith.constant 1.000000e+00 : f32
    %70 = vector.broadcast %cst_27 : f32 to vector<24x32xf32>
    %71 = arith.divf %70, %69 : vector<24x32xf32>
    %c0_i32_28 = arith.constant 0 : i32
    %c2_i32_29 = arith.constant 2 : i32
    %72 = arith.addi %c0_i32_28, %c2_i32_29 : i32
    %c1_i32_30 = arith.constant 1 : i32
    scf.for %arg11 = %c0_i32_28 to %72 step %c1_i32_30  : i32 {
      %c256_i32 = arith.constant 256 : i32
      %73 = arith.muli %arg11, %c256_i32 : i32
      %74 = tpu.assume_multiple %73, 256 : i32
      %c0_32 = arith.constant 0 : index
      %75 = arith.index_cast %74 : i32 to index
      %76 = vector.load %arg8[%c0_32, %75] : memref<16x512xf32, #tpu.memory_space<vmem>>, vector<16x256xf32>
      %cst_33 = arith.constant dense<0.000000e+00> : vector<24x256xf32>
      %77 = tpu.matmul %57, %76, %cst_33 {dimension_numbers = #tpu.dot_dimension_numbers<[1], [0], [0], [1], [0, 0, 1, 1], [], []>} : vector<24x16xf32>, vector<16x256xf32>, vector<24x256xf32> -> vector<24x256xf32>
      %c0_34 = arith.constant 0 : index
      %78 = arith.index_cast %74 : i32 to index
      %79 = vector.load %arg9[%c0_34, %78] : memref<32x512xf32, #tpu.memory_space<vmem>>, vector<32x256xf32>
      %cst_35 = arith.constant dense<0.000000e+00> : vector<24x256xf32>
      %80 = tpu.matmul %71, %79, %cst_35 {dimension_numbers = #tpu.dot_dimension_numbers<[1], [0], [0], [1], [0, 0, 1, 1], [], []>} : vector<24x32xf32>, vector<32x256xf32>, vector<24x256xf32> -> vector<24x256xf32>
      %c0_36 = arith.constant 0 : index
      %c0_37 = arith.constant 0 : index
      %81 = arith.index_cast %74 : i32 to index
      %82 = vector.load %arg1[%c0_36, %c0_37, %81] : memref<1x24x512xf32, #tpu.memory_space<vmem>>, vector<1x24x256xf32>
      %83 = vector.shape_cast %82 : vector<1x24x256xf32> to vector<24x256xf32>
      %84 = arith.mulf %83, %77 : vector<24x256xf32>
      %85 = arith.mulf %84, %80 : vector<24x256xf32>
      %c0_38 = arith.constant 0 : index
      %c0_39 = arith.constant 0 : index
      %86 = arith.index_cast %74 : i32 to index
      %87 = vector.load %arg10[%c0_38, %c0_39, %86] : memref<1x24x512xf32, #tpu.memory_space<vmem>>, vector<1x24x256xf32>
      %88 = vector.shape_cast %87 : vector<1x24x256xf32> to vector<24x256xf32>
      %89 = vector.shape_cast %85 : vector<24x256xf32> to vector<1x24x256xf32>
      tpu.vector_store %arg10[%c0_38, %c0_39, %86], %89 {strides = array<i32>} : memref<1x24x512xf32, #tpu.memory_space<vmem>>, vector<1x24x256xf32>,
    }
    %c2_i32_31 = arith.constant 2 : i32
    return
  }
  func.func @transform_0(%arg0: i32) -> (i32, i32, i32) {
    %c0_i32 = arith.constant 0 : i32
    %c0_i32_0 = arith.constant 0 : i32
    %c0_i32_1 = arith.constant 0 : i32
    return %arg0, %c0_i32, %c0_i32_0 : i32, i32, i32
  }
  func.func @transform_1(%arg0: i32) -> (i32, i32) {
    %c0_i32 = arith.constant 0 : i32
    %c0_i32_0 = arith.constant 0 : i32
    %c0_i32_1 = arith.constant 0 : i32
    return %c0_i32, %c0_i32_0 : i32, i32
  }
  func.func @transform_2(%arg0: i32) -> (i32, i32) {
    %c0_i32 = arith.constant 0 : i32
    %c0_i32_0 = arith.constant 0 : i32
    %c0_i32_1 = arith.constant 0 : i32
    return %c0_i32, %c0_i32_0 : i32, i32
  }
  func.func @transform_3(%arg0: i32) -> (i32, i32) {
    %c0_i32 = arith.constant 0 : i32
    %c0_i32_0 = arith.constant 0 : i32
    %c0_i32_1 = arith.constant 0 : i32
    return %c0_i32, %c0_i32_0 : i32, i32
  }
  func.func @transform_4(%arg0: i32) -> (i32, i32) {
    %c0_i32 = arith.constant 0 : i32
    %c0_i32_0 = arith.constant 0 : i32
    %c0_i32_1 = arith.constant 0 : i32
    return %c0_i32, %c0_i32_0 : i32, i32
  }
  func.func @transform_5(%arg0: i32) -> (i32, i32) {
    %c0_i32 = arith.constant 0 : i32
    %c0_i32_0 = arith.constant 0 : i32
    %c0_i32_1 = arith.constant 0 : i32
    return %c0_i32, %c0_i32_0 : i32, i32
  }
  func.func @transform_6(%arg0: i32) -> (i32, i32) {
    %c0_i32 = arith.constant 0 : i32
    %c0_i32_0 = arith.constant 0 : i32
    %c0_i32_1 = arith.constant 0 : i32
    return %c0_i32, %c0_i32_0 : i32, i32
  }
  func.func @transform_7(%arg0: i32) -> (i32, i32) {
    %c0_i32 = arith.constant 0 : i32
    %c0_i32_0 = arith.constant 0 : i32
    %c0_i32_1 = arith.constant 0 : i32
    return %c0_i32, %c0_i32_0 : i32, i32
  }
  func.func @transform_8(%arg0: i32) -> (i32, i32) {
    %c0_i32 = arith.constant 0 : i32
    %c0_i32_0 = arith.constant 0 : i32
    %c0_i32_1 = arith.constant 0 : i32
    return %c0_i32, %c0_i32_0 : i32, i32
  }
  func.func @transform_9(%arg0: i32) -> (i32, i32, i32) {
    %c0_i32 = arith.constant 0 : i32
    %c0_i32_0 = arith.constant 0 : i32
    %c0_i32_1 = arith.constant 0 : i32
    return %arg0, %c0_i32, %c0_i32_0 : i32, i32, i32
  }
}

</mosaic_0001>

<bundles_post_ra>
// kernel: tpu_custom_call.1
= control target key start
LH: loop header
LB: loop body
LE: loop exit
PB: predicated region body
PF: predicated region fallthrough
CT: control target
= control target key end

     0   :  { %s2261_s0 = inlined_call_operand.vmem [shape: f32[2,24,512], index: 0, kind: input, shape index: {}]   ;;  %s2262_s1 = inlined_call_operand.vmem [shape: f32[24,24], index: 1, kind: input, shape index: {}]   ;;  %s2263_s2 = inlined_call_operand.vmem [shape: f32[24,1], index: 2, kind: input, shape index: {}]   ;;  %s2264_s3 = inlined_call_operand.vmem [shape: f32[24,1], index: 3, kind: input, shape index: {}]   ;;  %s2265_s4 = inlined_call_operand.vmem [shape: f32[24,1], index: 4, kind: input, shape index: {}]   ;;  %s2266_s5 = inlined_call_operand.vmem [shape: f32[24,24], index: 5, kind: input, shape index: {}]   ;;  %s2267_s6 = inlined_call_operand.vmem [shape: f32[512,48], index: 6, kind: input, shape index: {}]   ;;  %s2268_s7 = inlined_call_operand.vmem [shape: f32[16,512], index: 7, kind: input, shape index: {}]   ;;  %s2269_s8 = inlined_call_operand.vmem [shape: f32[32,512], index: 8, kind: input, shape index: {}]   ;;  %s2270_s9 = inlined_call_operand.hbm [shape: f32[2,24,512], index: 9, kind: output, shape index: {}]  }
   0x1   :  { %2272 = sst [smem:[#allocation5_spill]] %s2261_s0 }
   0x2   :  { %14 = vsyncpa [#allocation3], 0 }
   0x3   :  { %16 = vsyncpa [#allocation3 + $0x1], 0  ;;  %s1847_s30 = smov 0   ;;  %s1849_s10 = smov 0  }
   0x4   :  { %s1851_s11 = smov 0   ;;  %s1853_s12 = smov 0  }
   0x5 LB: > { %s1868_s13 = sadd.s32 4294967295, %s1764_s12   ;;  %s1340_s14 = sadd.s32 4294967294, %s1764_s12   ;;  %s1764_s12 = sphi %s1853_s12, %s2285_s12   ;;  %s1760_s11 = sphi %s1851_s11, %s2284_s11   ;;  %s1756_s10 = sphi %s1849_s10, %s2283_s10   ;;  %s1752_s30 = sphi %s1847_s30, %s2282_s30  }
   0x6   : > { %s1872_s15 = sadd.s32 1, %s1764_s12   ;;  %s223_s16 = sadd.s32 1, %s1760_s11 }
   0x7   : > { %s220_s17 = ssub.s32 %s1764_s12, %s1872_s15  ;;  %p233_p0 = scmp.ne.s32.totalorder %s1760_s11, %s1756_s10 }
   0x8   : > { %p221_p1 = scmp.eq.s32.totalorder %s220_s17, 0  ;;  %p234_p2 = scmp.eq.s32.totalorder %s1868_s13, 1 }
   0x9   : > { %p239_p3 = scmp.ne.s32.totalorder %s1756_s10, %s1752_s30  ;;  %p240_p4 = scmp.eq.s32.totalorder %s1340_s14, 1 }
   0xa   : > { %s1883_s18 = scalar_select %p221_p1, %s1760_s11, %s223_s16  }
   0xb   : > { %p1885_p5 = por %p234_p2, %p233_p0  ;;  %p1889_p6 = por %p240_p4, %p239_p3 }
   0xc   : > { %p1343_p7 = scmp.ge.s32.totalorder %s1764_s12, 1  ;;  %p290_p8 = scmp.lt.s32.totalorder %s1764_s12, 3 }
   0xe   : > { %p291_p9 = pnand %p1343_p7, %p290_p8 }
   0xf   : > { %s2271_s21 = sand.u32 (!%p291_p9), 1, %s1756_s10   ;;  %p326_p10 = scmp.lt.s32.totalorder (!%p291_p9), %s1868_s13, 1  ;;  %v1908_v0 = vmov (!%p291_p9), 0.0   ;;  %v1910_v1 = vmov (!%p291_p9), 0.0   ;;  %v1912_v2 = vmov (!%p291_p9), 0.0  }
  0x10   : > { %294 = sbr.rel (%p291_p9) target bundleno = 2154 (0x86a), region = 56  ;;  %s2275_s0 = sld [smem:[#allocation5_spill]] (!%p291_p9) }
  0x11   : > { %s1899_s22 = smul.u32 (!%p291_p9), 96, %s2271_s21  ;;  %s1914_s29 = smov (!%p291_p9), 0  }
  0x17   : > { %s327_s23 = scalar_select %p326_p10, %s1868_s13, 1 }
  0x19   : > { %s1548_s24 = smul.u32 96, %s327_s23 }
  0x1b   : > { %s1905_s27 = scalar_lea.vmem %s2275_s0, %s1548_s24 }
  0x1c LB: >> { %s1345_s14 = sshll.u32 %s1780_s29, 8  ;;  %s336_s29 = sadd.s32 1, %s1780_s29   ;;  %s1780_s29 = sphi %s1914_s29, %s336_s29   ;;  %v1776_v2 = vphi %v1912_v2, %v2278_v2   ;;  %v1772_v1 = vphi %v1910_v1, %v2277_v1   ;;  %v1768_v0 = vphi %v1908_v0, %v2276_v0  }
  0x1d   : >> { %s1932_s23 = scalar_lea.vmem %s2267_s6, %s1345_s14  ;;  %s341_s24 = sshra.s32 %s1345_s14, 7 }
  0x1e   : >> { %v368_v3 = vld [vmem:[%s1932_s23 + $0x80] sm:$0xff]  ;;  %v369_v4 = vld [vmem:[%s1932_s23 + $0x88] sm:$0xff]  ;;  %v370_v8 = vld [vmem:[%s1932_s23 + $0x90] sm:$0xff]  ;;  %s1346_s25 = sshll.u32 %s341_s24, 3  ;;  %p333_p11 = scmp.ge.s32.totalorder %s336_s29, 2  }
  0x1f   : >> { %v352_v5 = vld [vmem:[%s1932_s23] sm:$0xff]  ;;  %v1474_v6 = vpack.c.bf16 %v369_v4, %v368_v3  ;;  %v353_v7 = vld [vmem:[%s1932_s23 + $0x8] sm:$0xff]  ;;  %v371_v9 = vld [vmem:[%s1932_s23 + $0x98] sm:$0xff]  ;;  %s1949_s26 = scalar_lea.vmem %s1905_s27, %s1346_s25  ;;  %vm1788_vm0 = vmmov (%p333_p11), 0   ;;  %vm491_vm1 = vcmask (%p333_p11), 195584   ;;  %vm581_vm2 = vcmask (%p333_p11), 130048  }
  0x20   : >> { %v1476_v10 = vpack.c.bf16 %v353_v7, %v352_v5  ;;  %v1478_v11 = vpack.c.bf16 %v371_v9, %v370_v8  ;;  %v354_v12 = vld [vmem:[%s1932_s23 + $0x10] sm:$0xff]  ;;  %v355_v13 = vld [vmem:[%s1932_s23 + $0x18] sm:$0xff]  ;;  %v372_v14 = vld [vmem:[%s1932_s23 + $0xa0] sm:$0xff]  ;;  %v1786_v9 = vmov (%p333_p11), 0.0|0.0   ;;  %vm606_vm3 = vcmask (%p333_p11), 261120  }
  0x21   : >> { %1527 = vmatprep.subr.bf16.mxu1 %v1474_v6  ;;  %1475 = vmatprep.subr.bf16.mxu0 %v1474_v6  ;;  %v373_v15 = vld [vmem:[%s1932_s23 + $0xa8] sm:$0xff]  ;;  %v1480_v16 = vpack.c.bf16 %v355_v13, %v354_v12  ;;  %v356_v18 = vld [vmem:[%s1932_s23 + $0x20] sm:$0xff]  ;;  %v374_v20 = vld [vmem:[%s1932_s23 + $0xb0] sm:$0xff]  ;;  %vm619_vm4 = vcmask (%p333_p11), 7168  }
  0x22   : >> { %1535 = vmatpush3.bf16.msra.mxu1 %v1476_v10  ;;  %1477 = vmatpush3.bf16.msra.mxu0 %v1476_v10  ;;  %v1482_v17 = vpack.c.bf16 %v373_v15, %v372_v14  ;;  %v357_v19 = vld [vmem:[%s1932_s23 + $0x28] sm:$0xff]  ;;  %v375_v21 = vld [vmem:[%s1932_s23 + $0xb8] sm:$0xff]  ;;  %v358_v24 = vld [vmem:[%s1932_s23 + $0x30] sm:$0xff] }
  0x23   : >> { %1528 = vmatprep.subr.bf16.mxu1 %v1478_v11  ;;  %1479 = vmatprep.subr.bf16.mxu0 %v1478_v11  ;;  %v1484_v22 = vpack.c.bf16 %v357_v19, %v356_v18  ;;  %v1486_v23 = vpack.c.bf16 %v375_v21, %v374_v20  ;;  %v359_v25 = vld [vmem:[%s1932_s23 + $0x38] sm:$0xff]  ;;  %v376_v26 = vld [vmem:[%s1932_s23 + $0xc0] sm:$0xff]  ;;  %v377_v27 = vld [vmem:[%s1932_s23 + $0xc8] sm:$0xff] }
  0x24   : >> { %v348_v28 = vld [vmem:[%s1949_s26 + $0x28] sm:$0xff]  ;;  %v1488_v30 = vpack.c.bf16 %v359_v25, %v358_v24  ;;  %v1490_v31 = vpack.c.bf16 %v377_v27, %v376_v26  ;;  %v360_v32 = vld [vmem:[%s1932_s23 + $0x40] sm:$0xff]  ;;  %v378_v34 = vld [vmem:[%s1932_s23 + $0xd0] sm:$0xff] }
  0x25   : >> { %453 = vmatprep.mubr.f32.mxu1 %v348_v28  ;;  %v346_v29 = vld [vmem:[%s1949_s26 + $0x8] sm:$0xff]  ;;  %v379_v35 = vld [vmem:[%s1932_s23 + $0xd8] sm:$0xff]  ;;  %v362_v38 = vld [vmem:[%s1932_s23 + $0x50] sm:$0xff] }
  0x26   : >> { %1536 = vmatpush3.bf16.msra.mxu1 %v1480_v16  ;;  %1481 = vmatpush3.bf16.msra.mxu0 %v1480_v16  ;;  %v361_v33 = vld [vmem:[%s1932_s23 + $0x48] sm:$0xff]  ;;  %v1494_v37 = vpack.c.bf16 %v379_v35, %v378_v34  ;;  %v363_v39 = vld [vmem:[%s1932_s23 + $0x58] sm:$0xff]  ;;  %v380_v40 = vld [vmem:[%s1932_s23 + $0xe0] sm:$0xff] }
  0x27   : >> { %1529 = vmatprep.subr.bf16.mxu1 %v1482_v17  ;;  %1483 = vmatprep.subr.bf16.mxu0 %v1482_v17  ;;  %v1492_v36 = vpack.c.bf16 %v361_v33, %v360_v32  ;;  %v381_v41 = vld [vmem:[%s1932_s23 + $0xe8] sm:$0xff]  ;;  %v1496_v42 = vpack.c.bf16 %v363_v39, %v362_v38  ;;  %v364_v44 = vld [vmem:[%s1932_s23 + $0x60] sm:$0xff]  ;;  %v382_v46 = vld [vmem:[%s1932_s23 + $0xf0] sm:$0xff] }
  0x28   : >> { %448 = vmatprep.mubr.f32.mxu0 %v346_v29  ;;  %v1498_v43 = vpack.c.bf16 %v381_v41, %v380_v40  ;;  %v365_v45 = vld [vmem:[%s1932_s23 + $0x68] sm:$0xff]  ;;  %v383_v47 = vld [vmem:[%s1932_s23 + $0xf8] sm:$0xff]  ;;  %v366_v50 = vld [vmem:[%s1932_s23 + $0x70] sm:$0xff] }
  0x29   : >> { %v1500_v48 = vpack.c.bf16 %v365_v45, %v364_v44  ;;  %v1502_v49 = vpack.c.bf16 %v383_v47, %v382_v46  ;;  %v367_v51 = vld [vmem:[%s1932_s23 + $0x78] sm:$0xff]  ;;  %v347_v53 = vld [vmem:[%s1949_s26 + $0x20] sm:$0xff]  ;;  %v350_v55 = vld [vmem:[%s1949_s26 + $0x48] sm:$0xff]  ;;  %s1790_s23 = smov (%p333_p11), 112  }
  0x2a   : >> { %1537 = vmatpush3.bf16.msra.mxu1 %v1484_v22  ;;  %1485 = vmatpush3.bf16.msra.mxu0 %v1484_v22  ;;  %v1504_v52 = vpack.c.bf16 %v367_v51, %v366_v50  ;;  %v345_v54 = vld [vmem:[%s1949_s26] sm:$0xff]  ;;  %v475_v12 = vld [vmem:[%s2263_s2 + $0x10] sm:$0xff] (%p333_p11)  ;;  %v468_v13 = vld [vmem:[%s2262_s1 + $0x8] sm:$0xff] (%p333_p11) }
  0x2b   : >> { %1530 = vmatprep.subr.bf16.mxu1 %v1486_v23  ;;  %1487 = vmatprep.subr.bf16.mxu0 %v1486_v23  ;;  %v349_v56 = vld [vmem:[%s1949_s26 + $0x40] sm:$0xff]  ;;  %v474_v14 = vld [vmem:[%s2263_s2 + $0x8] sm:$0xff] (%p333_p11)  ;;  %s2172_s26 = smov (%p333_p11), 0  }
  0x2c   : > { %v467_v10 = vld [vmem:[%s2262_s1] sm:$0xff] (%p333_p11) }
  0x2d   : > { %v473_v11 = vld [vmem:[%s2263_s2] sm:$0xff] (%p333_p11) }
  0x2e   : >> { %1538 = vmatpush3.bf16.msra.mxu1 %v1488_v30  ;;  %1489 = vmatpush3.bf16.msra.mxu0 %v1488_v30 }
  0x2f   : >> { %1531 = vmatprep.subr.bf16.mxu1 %v1490_v31  ;;  %1491 = vmatprep.subr.bf16.mxu0 %v1490_v31 }
  0x32   : >> { %1539 = vmatpush3.bf16.msra.mxu1 %v1492_v36  ;;  %1493 = vmatpush3.bf16.msra.mxu0 %v1492_v36  ;;  %v1791_v36 = vmov (%p333_p11), 1  }
  0x33   : >> { %1532 = vmatprep.subr.bf16.mxu1 %v1494_v37  ;;  %1495 = vmatprep.subr.bf16.mxu0 %v1494_v37 }
  0x36   : >> { %1540 = vmatpush3.bf16.msra.mxu1 %v1496_v42  ;;  %1497 = vmatpush3.bf16.msra.mxu0 %v1496_v42 }
  0x37   : >> { %1533 = vmatprep.subr.bf16.mxu1 %v1498_v43  ;;  %1499 = vmatprep.subr.bf16.mxu0 %v1498_v43 }
  0x3a   : >> { %1541 = vmatpush3.bf16.msra.mxu1 %v1500_v48  ;;  %1501 = vmatpush3.bf16.msra.mxu0 %v1500_v48 }
  0x3b   : >> { %1534 = vmatprep.subr.bf16.mxu1 %v1502_v49  ;;  %1503 = vmatprep.subr.bf16.mxu0 %v1502_v49 }
  0x3e   : >> { %1542 = vmatpush3.bf16.msra.mxu1 %v1504_v52  ;;  %1505 = vmatpush3.bf16.msra.mxu0 %v1504_v52  ;;  %v2051_v52 = vld [vmem:[%s2266_s5] sm:$0xff] (%p333_p11) }
  0x3f   : > { %1506 = vmatprep.subr.bf16.mxu0 (%p333_p11), %v1786_v9  ;;  %1543 = vmatprep.subr.bf16.mxu1 (%p333_p11), %v1786_v9 }
  0x41   : >> { %454 = vmatmul.mubr.f32.vlgmr.msra.gmra.mrb[0].mxu1 %v347_v53  ;;  %449 = vmatmul.mubr.f32.vlgmr.msra.gmra.mrb[0].mxu0 %v345_v54  ;;  %v2061_v54 = vld [vmem:[%s2266_s5 + $0x8] sm:$0xff] (%p333_p11) }
  0x42   : >> { %458 = vmatprep.mubr.f32.mxu1 %v350_v55  ;;  %v2070_v55 = vld [vmem:[%s2266_s5 + $0x10] sm:$0xff] (%p333_p11) }
  0x45   : >> { %459 = vmatmul.mubr.f32.gmra.mrb[2].mxu1 %v349_v56 }
 0x114   : >> { %v1405_v57 = vpop.f32.mrb[0].mxu1  ;;  %v1402_v58 = vpop.f32.mrb[0].mxu0 }
 0x115   : >> { %v1406_v59 = vpop.f32.mrb[1].mxu1  ;;  %v1403_v60 = vpop.f32.mrb[1].mxu0 }
 0x116   : >> { %v1407_v61 = vadd.f32 %v1406_v59, %v1405_v57  ;;  %v1404_v62 = vadd.f32 %v1403_v60, %v1402_v58 }
 0x118   : >> { %v465_v63 = vadd.f32 %v1772_v1, %v1407_v61   ;;  %v464_v3 = vadd.f32 %v1776_v2, %v1404_v62   ;;  %v1408_v4 = vpop.f32.mrb[2].mxu1  ;;  %335 = sbr.rel (!%p333_p11) target bundleno = 28 (0x1c), region = 111 }
 0x119   : >> { %v1409_v5 = vpop.f32.mrb[3].mxu1 }
 0x11a   : >> { %v1410_v6 = vadd.f32 %v1409_v5, %v1408_v4  ;;  %v2277_v1 = vmov %v465_v63  ;;  %v2278_v2 = vmov %v464_v3  ;;  %v1507_v8 = vpack.c.bf16 (%p333_p11), %v465_v63, %v464_v3 }
 0x11b   : > { %v1787_v2 = vmov (%p333_p11), 0.0   ;;  %v1789_v1 = vmov (%p333_p11), 0  }
 0x11c   : >> { %v466_v7 = vadd.f32 %v1768_v0, %v1410_v6   ;;  %1508 = vmatpush3.bf16.msra.mxu0 (%p333_p11), %v1507_v8  ;;  %1545 = vmatpush3.bf16.msra.mxu1 (%p333_p11), %v1507_v8 }
 0x11d   : > { %1433 = vmatprep.subr.mxu0 (%p333_p11), %v1787_v2  ;;  %1435 = vmatprep.mubr.msk.f32.mxu0 (%p333_p11), %vm1788_vm0, %v1787_v2 }
 0x11e   : >> { %v2276_v0 = vmov %v466_v7  ;;  %1544 = vmatprep.subr.mxu1 (%p333_p11), %v1787_v2  ;;  %1441 = vmatprep.mubr.msk.f32.mxu1 (%p333_p11), %vm1788_vm0, %v1787_v2 }
 0x11f   : > { %v469_v0 = vld [vmem:[%s2262_s1 + $0x10] sm:$0xff]  ;;  %1639 = vset.pattern.permute.xlu0 %v1789_v1  ;;  %1640 = vset.pattern.permute.xlu1 %v1789_v1 }
 0x120   : > { %1434 = vmatpush3.msra.mxu0 %v466_v7  ;;  %1546 = vmatpush3.msra.mxu1 %v466_v7 }
 0x121   : > { %1436 = vmatmul.mubr.msk.f32.vlgmr.msra.gmra.mrb[0].mxu0 %vm491_vm1, %v467_v10  ;;  %1442 = vmatmul.mubr.msk.f32.vlgmr.msra.gmra.mrb[0].mxu1 %vm491_vm1, %v469_v0 }
 0x122   : > { %1438 = vmatprep.mubr.msk.f32.mxu0 %vm1788_vm0, %v1787_v2  ;;  %478 = vperm.xlu0 %1639, %v473_v11  }
 0x123   : > { %488 = vperm.xlu1 %1640, %v475_v12   ;;  %1509 = vmatprep.subr.bf16.mxu1 %v1786_v9 }
 0x124   : > { %1450 = vmatprep.mubr.msk.f32.mxu1 %vm1788_vm0, %v1787_v2  ;;  %1512 = vmatprep.subr.bf16.mxu0 %v1786_v9 }
 0x125   : > { %1439 = vmatmul.mubr.msk.f32.gmra.mrb[2].mxu0 %vm491_vm1, %v468_v13 }
 0x126   : > { %483 = vperm.xlu0 %1639, %v474_v14   ;;  %1465 = vmatprep.mubr.msk.f32.mxu0 %vm1788_vm0, %v1787_v2 }
 0x127   : > { %1641 = vset.pattern.permute.xlu1 %v1791_v36 }
 0x12a   : > { %1642 = vset.pattern.permute.xlu0 %v1791_v36 }
 0x1a1   : > { %v479_v15 = vpop.permute.xlu0 %478 }
 0x1a2   : > { %v489_v16 = vpop.permute.xlu1 %488 }
 0x1a5   : > { %v484_v23 = vpop.permute.xlu0 %483 }
 0x1f4   : > { %v567_v17 = vpop.f32.mrb[0].mxu0  ;;  %v577_v18 = vpop.f32.mrb[0].mxu1 }
 0x1f5   : > { %v2022_v19 = vadd.f32 %v567_v17, %v479_v15  ;;  %v1437_v20 = vpop.f32.mrb[1].mxu0  ;;  %v1443_v21 = vpop.f32.mrb[1].mxu1  ;;  %v2026_v22 = vadd.f32 %v577_v18, %v489_v16 }
 0x1f7   : > { %597 = vrot.lane.b32.xlu1 %v2022_v19, %s1790_s23  ;;  %v582_v27 = vsel %vm581_vm2, %v2022_v19, 0.0  ;;  %v588_v29 = vsel %vm581_vm2, %v2026_v22, 0.0 }
 0x1f8   : > { %v572_v24 = vpop.f32.mrb[2].mxu0 }
 0x1f9   : > { %v2028_v25 = vadd.f32 %v572_v24, %v484_v23  ;;  %v1440_v26 = vpop.f32.mrb[3].mxu0 }
 0x1fb   : > { %601 = vrot.lane.b32.xlu1 %v2026_v22, %s1790_s23  ;;  %599 = vrot.lane.b32.xlu0 %v2028_v25, %s1790_s23  ;;  %v585_v28 = vsel %vm581_vm2, %v2028_v25, 0.0 }
 0x21a   : > { %583 = vadd.xlane.f32.xlu0 %v582_v27 }
 0x21f   : > { %586 = vadd.xlane.f32.xlu1 %v585_v28  ;;  %v874_v28 = vld [vmem:[%s2264_s3 + $0x8] sm:$0xff] }
 0x223   : > { %589 = vadd.xlane.f32.xlu1 %v588_v29  ;;  %v876_v29 = vld [vmem:[%s2265_s4] sm:$0xff] }
 0x269   : > { %v598_v30 = vpop.permute.xlu1 %597 }
 0x26a   : > { %v607_v31 = vsel %vm606_vm3, %v598_v30, 0.0 }
 0x26b   : > { %608 = vadd.xlane.f32.xlu0 %v607_v31 }
 0x26d   : > { %v600_v32 = vpop.permute.xlu0 %599  ;;  %v602_v33 = vpop.permute.xlu1 %601 }
 0x26e   : > { %v610_v34 = vsel %vm606_vm3, %v600_v32, 0.0  ;;  %v613_v35 = vsel %vm606_vm3, %v602_v33, 0.0 }
 0x26f   : > { %611 = vadd.xlane.f32.xlu0 %v610_v34 }
 0x273   : > { %614 = vadd.xlane.f32.xlu0 %v613_v35 }
 0x2a7   : > { %v584_v37 = vpop.xlane.xlu0 %583 }
 0x2a8   : > { %v591_v42 = vmul.f32 0.03125, %v584_v37 }
 0x2ac   : > { %v587_v39 = vpop.xlane.xlu1 %586 }
 0x2ad   : > { %v592_v43 = vmul.f32 0.03125, %v587_v39 }
 0x2b0   : > { %v590_v47 = vpop.xlane.xlu1 %589 }
 0x2b1   : > { %v593_v51 = vmul.f32 0.03125, %v590_v47  ;;  %v875_v47 = vld [vmem:[%s2264_s3 + $0x10] sm:$0xff] }
 0x2f8   : > { %v609_v38 = vpop.xlane.xlu0 %608 }
 0x2f9   : > { %v616_v40 = vmul.f32 0.015625, %v609_v38 }
 0x2fb   : > { %v620_v45 = vsel %vm619_vm4, %v591_v42, %v616_v40 }
 0x2fc   : > { %v612_v41 = vpop.xlane.xlu0 %611 }
 0x2fd   : > { %v617_v44 = vmul.f32 0.015625, %v612_v41 }
 0x2ff   : > { %v621_v46 = vsel %vm619_vm4, %v592_v43, %v617_v44 }
 0x300   : > { %v1510_v48 = vpack.c.bf16 %v621_v46, %v620_v45  ;;  %v615_v49 = vpop.xlane.xlu0 %614 }
 0x301   : > { %v618_v50 = vmul.f32 0.015625, %v615_v49 }
 0x302   : > { %1511 = vmatpush3.bf16.msra.mxu1 %v1510_v48 }
 0x303   : > { %1448 = vmatprep.subr.mxu1 %v1787_v2  ;;  %v622_v53 = vsel %vm619_vm4, %v593_v51, %v618_v50 }
 0x306   : > { %1449 = vmatpush3.msra.mxu1 %v622_v53 }
 0x307   : > { %1451 = vmatmul.mubr.msk.f32.vlgmr.msra.gmra.mrb[2].mxu1 %vm491_vm1, %v2051_v52 }
 0x308   : > { %1453 = vmatprep.mubr.msk.f32.mxu1 %vm1788_vm0, %v1787_v2 }
 0x30b   : > { %1454 = vmatmul.mubr.msk.f32.gmra.mrb[4].mxu1 %vm491_vm1, %v2061_v54 }
 0x30c   : > { %1456 = vmatprep.mubr.msk.f32.mxu1 %vm1788_vm0, %v1787_v2 }
 0x30f   : > { %1457 = vmatmul.mubr.msk.f32.gmra.mrb[6].mxu1 %vm491_vm1, %v2070_v55 }
 0x3da   : > { %v698_v56 = vpop.f32.mrb[2].mxu1 }
 0x3db   : > { %731 = vperm.xlu1 %1641, %v698_v56   ;;  %v1452_v57 = vpop.f32.mrb[3].mxu1 }
 0x3de   : > { %v703_v58 = vpop.f32.mrb[4].mxu1 }
 0x3df   : > { %735 = vperm.xlu0 %1642, %v703_v58   ;;  %v1455_v59 = vpop.f32.mrb[5].mxu1 }
 0x3e2   : > { %v708_v60 = vpop.f32.mrb[6].mxu1 }
 0x3e3   : > { %739 = vperm.xlu1 %1641, %v708_v60   ;;  %v1458_v61 = vpop.f32.mrb[7].mxu1  ;;  %1644 = vset.pattern.permute.xlu0 %v1789_v1 }
 0x3e7   : > { %1643 = vset.pattern.permute.xlu1 %v1789_v1 }
 0x3e8   : > { %714 = vperm.xlu1 %1643, %v698_v56  }
 0x3ec   : > { %719 = vperm.xlu1 %1643, %v703_v58  }
 0x3f0   : > { %724 = vperm.xlu1 %1643, %v708_v60   ;;  %v878_v60 = vld [vmem:[%s2265_s4 + $0x10] sm:$0xff] }
 0x45a   : > { %v732_v62 = vpop.permute.xlu1 %731 }
 0x45b   : > { %v2077_v63 = vsub.f32 %v2022_v19, %v732_v62 }
 0x45d   : > { %v760_v3 = vmul.f32 %v2077_v63, %v2077_v63 }
 0x45e   : > { %v736_v4 = vpop.permute.xlu0 %735 }
 0x45f   : > { %v2082_v5 = vsub.f32 %v2028_v25, %v736_v4  ;;  %766 = vrot.lane.b32.xlu1 %v760_v3, %s1790_s23 }
 0x461   : > { %v761_v6 = vmul.f32 %v2082_v5, %v2082_v5 }
 0x462   : > { %v740_v7 = vpop.permute.xlu1 %739 }
 0x463   : > { %v2088_v8 = vsub.f32 %v2026_v22, %v740_v7  ;;  %768 = vrot.lane.b32.xlu1 %v761_v6, %s1790_s23 }
 0x465   : > { %v762_v9 = vmul.f32 %v2088_v8, %v2088_v8 }
 0x467   : > { %770 = vrot.lane.b32.xlu1 %v762_v9, %s1790_s23  ;;  %v715_v10 = vpop.permute.xlu1 %714 }
 0x468   : > { %v2101_v14 = vsub.f32 %v2022_v19, %v715_v10 }
 0x46a   : > { %v745_v15 = vmul.f32 %v2101_v14, %v2101_v14 }
 0x46b   : > { %v720_v0 = vpop.permute.xlu1 %719 }
 0x46c   : > { %v2095_v11 = vsub.f32 %v2028_v25, %v720_v0  ;;  %v748_v16 = vsel %vm581_vm2, %v745_v15, 0.0 }
 0x46e   : > { %v746_v12 = vmul.f32 %v2095_v11, %v2095_v11 }
 0x46f   : > { %v725_v17 = vpop.permute.xlu1 %724 }
 0x470   : > { %v751_v13 = vsel %vm581_vm2, %v746_v12, 0.0  ;;  %v2107_v18 = vsub.f32 %v2026_v22, %v725_v17  ;;  %v873_v22 = vld [vmem:[%s2264_s3] sm:$0xff] }
 0x471   : > { %752 = vadd.xlane.f32.xlu0 %v751_v13 }
 0x472   : > { %v747_v23 = vmul.f32 %v2107_v18, %v2107_v18 }
 0x474   : > { %v754_v19 = vsel %vm581_vm2, %v747_v23, 0.0 }
 0x48b   : > { %749 = vadd.xlane.f32.xlu1 %v748_v16 }
 0x4d1   : > { %v767_v20 = vpop.permute.xlu1 %766 }
 0x4d2   : > { %v775_v21 = vsel %vm606_vm3, %v767_v20, 0.0 }
 0x4d3   : > { %776 = vadd.xlane.f32.xlu0 %v775_v21 }
 0x4d5   : > { %v769_v24 = vpop.permute.xlu1 %768 }
 0x4d6   : > { %v778_v25 = vsel %vm606_vm3, %v769_v24, 0.0 }
 0x4d7   : > { %755 = vadd.xlane.f32.xlu0 %v754_v19  ;;  %779 = vadd.xlane.f32.xlu1 %v778_v25 }
 0x4d9   : > { %v771_v26 = vpop.permute.xlu1 %770 }
 0x4da   : > { %v781_v27 = vsel %vm606_vm3, %v771_v26, 0.0 }
 0x4db   : > { %782 = vadd.xlane.f32.xlu1 %v781_v27 }
 0x4ec   : > { %899 = vperm.xlu1 %1643, %v873_v22  }
 0x4ed   : > { %909 = vperm.xlu0 %1644, %v875_v47  }
 0x4f0   : > { %904 = vperm.xlu1 %1643, %v874_v28  }
 0x4f4   : > { %917 = vperm.xlu1 %1643, %v876_v29  }
 0x4f8   : > { %1645 = vset.pattern.permute.xlu1 %v1791_v36 }
 0x4fe   : > { %v753_v30 = vpop.xlane.xlu0 %752 }
 0x4ff   : > { %v758_v35 = vmul.f32 0.03125, %v753_v30 }
 0x518   : > { %v750_v31 = vpop.xlane.xlu1 %749 }
 0x519   : > { %v757_v37 = vmul.f32 0.03125, %v750_v31 }
 0x560   : > { %v777_v32 = vpop.xlane.xlu0 %776 }
 0x561   : > { %v784_v33 = vmul.f32 0.015625, %v777_v32 }
 0x563   : > { %v787_v39 = vsel %vm619_vm4, %v757_v37, %v784_v33 }
 0x564   : > { %v780_v34 = vpop.xlane.xlu1 %779  ;;  %v756_v41 = vpop.xlane.xlu0 %755 }
 0x565   : > { %v785_v38 = vmul.f32 0.015625, %v780_v34  ;;  %v759_v45 = vmul.f32 0.03125, %v756_v41 }
 0x567   : > { %v788_v40 = vsel %vm619_vm4, %v758_v35, %v785_v38 }
 0x568   : > { %v1513_v42 = vpack.c.bf16 %v788_v40, %v787_v39  ;;  %v783_v43 = vpop.xlane.xlu1 %782 }
 0x569   : > { %v786_v44 = vmul.f32 0.015625, %v783_v43 }
 0x56a   : > { %1514 = vmatpush3.bf16.msra.mxu0 %v1513_v42 }
 0x56b   : > { %1463 = vmatprep.subr.mxu0 %v1787_v2  ;;  %v789_v46 = vsel %vm619_vm4, %v759_v45, %v786_v44 }
 0x56c   : > { %v900_v61 = vpop.permute.xlu1 %899  ;;  %v910_v3 = vpop.permute.xlu0 %909 }
 0x56e   : > { %1464 = vmatpush3.msra.mxu0 %v789_v46 }
 0x56f   : > { %1466 = vmatmul.mubr.msk.f32.vlgmr.msra.gmra.mrb[4].mxu0 %vm491_vm1, %v2051_v52 }
 0x570   : > { %1468 = vmatprep.mubr.msk.f32.mxu0 %vm1788_vm0, %v1787_v2  ;;  %v905_v62 = vpop.permute.xlu1 %904 }
 0x573   : > { %1469 = vmatmul.mubr.msk.f32.gmra.mrb[6].mxu0 %vm491_vm1, %v2061_v54 }
 0x574   : > { %1471 = vmatprep.mubr.msk.f32.mxu0 %vm1788_vm0, %v1787_v2  ;;  %v918_v4 = vpop.permute.xlu1 %917 }
 0x577   : > { %1472 = vmatmul.mubr.msk.f32.gmra.mrb[8].mxu0 %vm491_vm1, %v2070_v55  ;;  %v877_v55 = vld [vmem:[%s2265_s4 + $0x8] sm:$0xff] }
 0x642   : > { %v856_v48 = vpop.f32.mrb[4].mxu0 }
 0x643   : > { %v857_v49 = vadd.f32 1e-05, %v856_v48  ;;  %v1467_v50 = vpop.f32.mrb[5].mxu0 }
 0x645   : > { %1652 = vrsqrt.f32 %v857_v49 }
 0x646   : > { %v861_v51 = vpop.f32.mrb[6].mxu0 }
 0x647   : > { %v862_v52 = vadd.f32 1e-05, %v861_v51  ;;  %v1470_v53 = vpop.f32.mrb[7].mxu0 }
 0x649   : > { %1654 = vrsqrt.f32 %v862_v52 }
 0x64a   : > { %v866_v54 = vpop.f32.mrb[8].mxu0 }
 0x64b   : > { %v1473_v56 = vpop.f32.mrb[9].mxu0  ;;  %v867_v57 = vadd.f32 1e-05, %v866_v54 }
 0x64d   : > { %1656 = vrsqrt.f32 %v867_v57 }
 0x64f   : > { %v1653_v2 = vpop.eup %1652 }
 0x650   : > { %952 = vperm.xlu1 %1645, %v1653_v2   ;;  %881 = vperm.xlu0 %1644, %v1653_v2  }
 0x653   : > { %v1655_v58 = vpop.eup %1654 }
 0x654   : > { %1646 = vset.pattern.permute.xlu1 %v1789_v1  ;;  %922 = vperm.xlu0 %1644, %v877_v55  }
 0x655   : > { %886 = vperm.xlu1 %1646, %v1655_v58  }
 0x657   : > { %v1657_v59 = vpop.eup %1656 }
 0x658   : > { %1651 = vset.pattern.permute.xlu0 %v1791_v36 }
 0x659   : > { %1647 = vset.pattern.permute.xlu1 %v1791_v36 }
 0x65a   : > { %956 = vperm.xlu1 %1647, %v1655_v58  }
 0x65e   : > { %1648 = vset.pattern.permute.xlu1 %v1789_v1 }
 0x65f   : > { %891 = vperm.xlu1 %1648, %v1657_v59  }
 0x663   : > { %1649 = vset.pattern.permute.xlu1 %v1791_v36 }
 0x664   : > { %960 = vperm.xlu1 %1649, %v1657_v59  }
 0x668   : > { %1650 = vset.pattern.permute.xlu1 %v1789_v1 }
 0x669   : > { %927 = vperm.xlu1 %1650, %v878_v60  }
 0x6cf   : > { %v953_v6 = vpop.permute.xlu1 %952  ;;  %v882_v7 = vpop.permute.xlu0 %881 }
 0x6d0   : > { %v963_v9 = vmul.f32 %v953_v6, %v2077_v63  ;;  %v894_v10 = vmul.f32 %v882_v7, %v2101_v14 }
 0x6d2   : > { %v966_v0 = vmul.f32 %v963_v9, %v900_v61  ;;  %v912_v36 = vmul.f32 %v900_v61, %v894_v10 }
 0x6d3   : > { %v923_v20 = vpop.permute.xlu0 %922 }
 0x6d4   : > { %v969_v12 = vadd.f32 %v966_v0, %v918_v4  ;;  %v930_v13 = vadd.f32 %v918_v4, %v912_v36  ;;  %v887_v15 = vpop.permute.xlu1 %886 }
 0x6d5   : > { %v895_v16 = vmul.f32 %v887_v15, %v2095_v11 }
 0x6d6   : > { %v972_v17 = vsub.f32 0.0, %v969_v12  ;;  %v933_v1 = vsub.f32 0.0, %v930_v13 }
 0x6d7   : > { %v913_v21 = vmul.f32 %v905_v62, %v895_v16 }
 0x6d8   : > { %v975_v23 = vmul.f32 1.442695, %v972_v17  ;;  %v936_v24 = vmul.f32 1.442695, %v933_v1 }
 0x6d9   : > { %v931_v19 = vadd.f32 %v923_v20, %v913_v21  ;;  %v957_v25 = vpop.permute.xlu1 %956 }
 0x6da   : > { %1658 = vpow2.f32 %v975_v23  ;;  %v964_v63 = vmul.f32 %v957_v25, %v2082_v5 }
 0x6db   : > { %1660 = vpow2.f32 %v936_v24  ;;  %v934_v14 = vsub.f32 0.0, %v931_v19 }
 0x6dc   : > { %v967_v26 = vmul.f32 %v964_v63, %v905_v62 }
 0x6dd   : > { %v938_v27 = vmul.f32 1.442695, %v934_v14 }
 0x6de   : > { %v970_v22 = vadd.f32 %v967_v26, %v923_v20  ;;  %v892_v28 = vpop.permute.xlu1 %891 }
 0x6df   : > { %1662 = vpow2.f32 %v938_v27  ;;  %v896_v30 = vmul.f32 %v892_v28, %v2107_v18 }
 0x6e0   : > { %v973_v29 = vsub.f32 0.0, %v970_v22 }
 0x6e1   : > { %v914_v38 = vmul.f32 %v910_v3, %v896_v30 }
 0x6e2   : > { %v977_v11 = vmul.f32 1.442695, %v973_v29 }
 0x6e3   : > { %v961_v31 = vpop.permute.xlu1 %960 }
 0x6e4   : > { %v1659_v32 = vpop.eup %1658  ;;  %1664 = vpow2.f32 %v977_v11  ;;  %v965_v33 = vmul.f32 %v961_v31, %v2088_v8 }
 0x6e5   : > { %v1661_v34 = vpop.eup %1660  ;;  %v981_v35 = vadd.f32 1.0, %v1659_v32 }
 0x6e6   : > { %v942_v37 = vadd.f32 1.0, %v1661_v34  ;;  %v968_v5 = vmul.f32 %v965_v33, %v910_v3 }
 0x6e7   : > { %1666 = vrcp.f32 %v981_v35 }
 0x6e8   : > { %1668 = vrcp.f32 %v942_v37  ;;  %v928_v39 = vpop.permute.xlu1 %927 }
 0x6e9   : > { %v1663_v40 = vpop.eup %1662  ;;  %v932_v41 = vadd.f32 %v928_v39, %v914_v38  ;;  %v971_v42 = vadd.f32 %v968_v5, %v928_v39 }
 0x6ea   : > { %v943_v43 = vadd.f32 1.0, %v1663_v40 }
 0x6eb   : > { %v935_v44 = vsub.f32 0.0, %v932_v41  ;;  %v974_v45 = vsub.f32 0.0, %v971_v42 }
 0x6ec   : > { %1670 = vrcp.f32 %v943_v43 }
 0x6ed   : > { %v940_v18 = vmul.f32 1.442695, %v935_v44  ;;  %v979_v46 = vmul.f32 1.442695, %v974_v45 }
 0x6ee   : > { %v1665_v47 = vpop.eup %1664 }
 0x6ef   : > { %v982_v48 = vadd.f32 1.0, %v1665_v47  ;;  %1672 = vpow2.f32 %v940_v18 }
 0x6f0   : > { %1674 = vpow2.f32 %v979_v46 }
 0x6f1   : > { %v2160_v8 = vpop.eup %1666  ;;  %1676 = vrcp.f32 %v982_v48 }
 0x6f2   : > { %v2162_v49 = vpop.eup %1668 }
 0x6f6   : > { %v2164_v50 = vpop.eup %1670 }
 0x6f9   : > { %v1673_v51 = vpop.eup %1672 }
 0x6fa   : > { %v1675_v52 = vpop.eup %1674  ;;  %v944_v53 = vadd.f32 1.0, %v1673_v51 }
 0x6fb   : > { %v2166_v54 = vpop.eup %1676  ;;  %v983_v56 = vadd.f32 1.0, %v1675_v52 }
 0x6fc   : > { %1678 = vrcp.f32 %v944_v53 }
 0x6fd   : > { %1680 = vrcp.f32 %v983_v56 }
 0x706   : > { %v2168_v57 = vpop.eup %1678 }
 0x707   : > { %v2170_v2 = vpop.eup %1680 }
 0x708 LB: >> { %s1792_s14 = smov 112   ;;  %s1356_s16 = sshll.u32 %s1784_s26, 8  ;;  %v1793_v55 = vmov 0.0   ;;  %s1784_s26 = sphi %s2172_s26, %s995_s26  }
 0x709   : >> { %1110 = vrot.lane.b32.xlu0 %v2160_v8, %s1792_s14  ;;  %1114 = vrot.lane.b32.xlu1 %v2170_v2, %s1792_s14  ;;  %s997_s29 = sshra.s32 %s1356_s16, 7  ;;  %s2279_s21 = scalar_lea.vmem [#allocation2], %s1899_s22 }
 0x70a   : >> { %1078 = vmatprep.mubr.f32.mxu0 %v1793_v55  ;;  %1186 = vmatprep.mubr.f32.mxu1 %v1793_v55  ;;  %s2180_s17 = sshll.u32 %s997_s29, 3  ;;  %s995_s26 = sadd.s32 1, %s1784_s26  }
 0x70b   : >> { %s1098_s25 = scalar_lea.vmem %s2269_s8, %s2180_s17  ;;  %s1000_s0 = scalar_lea.vmem %s2268_s7, %s2180_s17 }
 0x70c   : >> { %v1100_v58 = vld [vmem:[%s1098_s25 + $0x8] sm:$0xff]  ;;  %v1099_v3 = vld [vmem:[%s1098_s25] sm:$0xff]  ;;  %s1226_s28 = scalar_lea.vmem %s2279_s21, %s2180_s17 [#allocation2]  ;;  %p992_p12 = scmp.ge.s32.totalorder %s995_s26, 2  }
 0x70d   : >> { %1112 = vrot.lane.b32.xlu0 %v2166_v54, %s1792_s14  ;;  %v1102_v59 = vld [vmem:[%s1098_s25 + $0x28] sm:$0xff]  ;;  %v1101_v4 = vld [vmem:[%s1098_s25 + $0x20] sm:$0xff]  ;;  %s1549_s14 = smul.u32 (%p992_p12), 1536, %s1868_s13  ;;  %s2280_s16 = scalar_lea.vmem (%p992_p12), [#allocation2], %s1899_s22 }
 0x70e   : >> { %v1002_v60 = vld [vmem:[%s1000_s0 + $0x8] sm:$0xff]  ;;  %v1519_v61 = vpack.c.bf16 %v1102_v59, %v1100_v58  ;;  %v1521_v7 = vpack.c.bf16 %v1101_v4, %v1099_v3  ;;  %v1001_v9 = vld [vmem:[%s1000_s0] sm:$0xff]  ;;  %s1247_s29 = sshll.u32 (%p992_p12), %s2280_s16, 4  ;;  %s1794_s13 = smov (%p992_p12), [#allocation2]   ;;  %s2216_s29 = int_to_ptr.vmem [resolvable:$true] %s1247_s29 }
 0x70f   : >> { %v1004_v62 = vld [vmem:[%s1000_s0 + $0x28] sm:$0xff]  ;;  %v1003_v10 = vld [vmem:[%s1000_s0 + $0x20] sm:$0xff]  ;;  %s1206_s0 = scalar_lea.vmem %s1905_s27, %s2180_s17  ;;  %s2214_s24 = scalar_lea.hbm (%p992_p12), %s2270_s9, %s1549_s14 }
 0x710   : >> { %v1515_v6 = vpack.c.bf16 %v1004_v62, %v1002_v60  ;;  %v1104_v0 = vld [vmem:[%s1098_s25 + $0x48] sm:$0xff]  ;;  %1520 = vmatprep.subr.bf16.mxu1 %v1519_v61  ;;  %v1517_v36 = vpack.c.bf16 %v1003_v10, %v1001_v9  ;;  %v1103_v13 = vld [vmem:[%s1098_s25 + $0x40] sm:$0xff]  ;;  %s1682_s27 = scalar_lea.vmem (%p992_p12), %s2216_s29, 1536  ;;  %s1686_s22 = sshll.u32 (%p992_p12), %s1794_s13, 4  ;;  %s1687_s22 = int_to_ptr.vmem [resolvable:$false] %s1686_s22 }
 0x711   : >> { %v1106_v12 = vld [vmem:[%s1098_s25 + $0x68] sm:$0xff]  ;;  %v1105_v15 = vld [vmem:[%s1098_s25 + $0x60] sm:$0xff]  ;;  %1522 = vmatpush1.bf16.msra.mxu1 %v1521_v7  ;;  %s2281_s25 = sand.u32 (%p992_p12), 1, %s1756_s10   ;;  %p1683_p13 = scmp.ne.s32.totalorder (%p992_p12), %s2216_s29, %s1682_s27 }
 0x712   : >> { %1516 = vmatprep.subr.bf16.mxu0 %v1515_v6  ;;  %v1523_v16 = vpack.c.bf16 %v1106_v12, %v1104_v0  ;;  %v1525_v17 = vpack.c.bf16 %v1105_v15, %v1103_v13  ;;  %v1207_v26 = vld [vmem:[%s1206_s0] sm:$0xff]  ;;  %v1208_v27 = vld [vmem:[%s1206_s0 + $0x8] sm:$0xff]  ;;  %s2220_s26 = scalar_lea.sflag (%p992_p12), [#allocation3], %s2281_s25  ;;  %p1689_p2 = scmp.lt.s32.totalorder (%p992_p12), %s2216_s29, %s1687_s22 }
 0x713   : >> { %1518 = vmatpush1.bf16.msra.mxu0 %v1517_v36  ;;  %v1209_v29 = vld [vmem:[%s1206_s0 + $0x20] sm:$0xff]  ;;  %v1210_v11 = vld [vmem:[%s1206_s0 + $0x28] sm:$0xff]  ;;  %p1684_p0 = pnand (%p992_p12), %p1683_p13, %p1885_p5 }
 0x714   : >> { %1524 = vmatprep.subr.bf16.mxu1 %v1523_v16  ;;  %v1211_v37 = vld [vmem:[%s1206_s0 + $0x40] sm:$0xff]  ;;  %v1212_v5 = vld [vmem:[%s1206_s0 + $0x48] sm:$0xff]  ;;  %s1688_s0 = scalar_lea.vmem (%p992_p12), %s1687_s22, 3072 }
 0x715   : >> { %1526 = vmatpush1.bf16.msra.mxu1 %v1525_v17  ;;  %p1685_p1 = pneg (%p992_p12), %p1684_p0  ;;  %p1690_p3 = scmp.lt.s32.totalorder (%p992_p12), %s1688_s0, %s1682_s27 }
 0x716   : >> { %1358 = vmatmul.mubr.msk.f32.vlgmr.msra.gmra.mrb[0].mxu0 %vm581_vm2, %v2162_v49 }
 0x717   : >> { %1084 = vmatprep.mubr.f32.mxu0 %v1793_v55  ;;  %p1691_p4 = por (%p992_p12), %p1690_p3, %p1689_p2 }
 0x719   : > { %p1692_p7 = pnand (%p992_p12), %p1691_p4, %p1685_p1 }
 0x71a   : >> { %1359 = vmatmul.mubr.msk.f32.gmra.mrb[2].mxu0 %vm581_vm2, %v2164_v50 }
 0x71b   : >> { %1090 = vmatprep.mubr.f32.mxu0 %v1793_v55 }
 0x71e   : >> { %1360 = vmatmul.mubr.msk.f32.gmra.mrb[4].mxu0 %vm581_vm2, %v2168_v57 }
 0x77b   : >> { %v1111_v1 = vpop.permute.xlu0 %1110  ;;  %v1115_v21 = vpop.permute.xlu1 %1114 }
 0x77c   : >> { %1362 = vmatmul.mubr.msk.f32.vlgmr.msra.gmra.mrb[0].mxu1 %vm606_vm3, %v1111_v1 }
 0x77d   : >> { %1192 = vmatprep.mubr.f32.mxu1 %v1793_v55 }
 0x77f   : >> { %v1113_v20 = vpop.permute.xlu0 %1112 }
 0x780   : >> { %1363 = vmatmul.mubr.msk.f32.gmra.mrb[2].mxu1 %vm606_vm3, %v1113_v20 }
 0x781   : >> { %1198 = vmatprep.mubr.f32.mxu1 %v1793_v55 }
 0x784   : >> { %1364 = vmatmul.mubr.msk.f32.gmra.mrb[4].mxu1 %vm606_vm3, %v1115_v21 }
 0x7e9   : >> { %v1080_v23 = vpop.f32.mrb[0].mxu0 }
 0x7ea   : >> { %v1082_v24 = vpop.f32.mrb[1].mxu0  ;;  %v1213_v22 = vmul.f32 %v1207_v26, %v1080_v23 }
 0x7eb   : >> { %v1214_v28 = vmul.f32 %v1208_v27, %v1082_v24 }
 0x7ed   : >> { %v1086_v19 = vpop.f32.mrb[2].mxu0 }
 0x7ee   : >> { %v1088_v25 = vpop.f32.mrb[3].mxu0  ;;  %v1215_v32 = vmul.f32 %v1209_v29, %v1086_v19 }
 0x7ef   : >> { %v1216_v35 = vmul.f32 %v1210_v11, %v1088_v25 }
 0x7f1   : >> { %v1092_v63 = vpop.f32.mrb[4].mxu0 }
 0x7f2   : >> { %v1094_v14 = vpop.f32.mrb[5].mxu0  ;;  %v1217_v40 = vmul.f32 %v1211_v37, %v1092_v63 }
 0x7f3   : >> { %v1218_v43 = vmul.f32 %v1212_v5, %v1094_v14 }
 0x84f   : >> { %v1188_v30 = vpop.f32.mrb[0].mxu1 }
 0x850   : >> { %v1219_v31 = vmul.f32 %v1213_v22, %v1188_v30  ;;  %v1190_v33 = vpop.f32.mrb[1].mxu1 }
 0x851   : >> { %v1220_v34 = vmul.f32 %v1214_v28, %v1190_v33 }
 0x852   : >> { %1227 = vst [vmem:[%s1226_s28] sm:$0xff] %v1219_v31 }
 0x853   : >> { %1228 = vst [vmem:[%s1226_s28 + $0x8] sm:$0xff] %v1220_v34  ;;  %v1194_v38 = vpop.f32.mrb[2].mxu1 }
 0x854   : >> { %v1221_v39 = vmul.f32 %v1215_v32, %v1194_v38  ;;  %v1196_v41 = vpop.f32.mrb[3].mxu1 }
 0x855   : >> { %v1222_v42 = vmul.f32 %v1216_v35, %v1196_v41  ;;  %994 = sbr.rel (!%p992_p12) target bundleno = 1800 (0x708), region = 122 }
 0x856   : >> { %1229 = vst [vmem:[%s1226_s28 + $0x20] sm:$0xff] %v1221_v39 }
 0x857   : >> { %1230 = vst [vmem:[%s1226_s28 + $0x28] sm:$0xff] %v1222_v42  ;;  %v1200_v44 = vpop.f32.mrb[4].mxu1 }
 0x858   : >> { %v1223_v45 = vmul.f32 %v1217_v40, %v1200_v44  ;;  %v1202_v18 = vpop.f32.mrb[5].mxu1 }
 0x859   : >> { %v1224_v46 = vmul.f32 %v1218_v43, %v1202_v18 }
 0x85a   : >> { %1231 = vst [vmem:[%s1226_s28 + $0x40] sm:$0xff] %v1223_v45 }
 0x85b   : >> { %1232 = vst [vmem:[%s1226_s28 + $0x48] sm:$0xff] %v1224_v46 }
 0x85c   : > { %1695 = shalt.err (!%p1692_p7)
}
 0x85d   : > { %s1696_s21 = scalar_lea.hbm %s2214_s24, 1536  ;;  %s1700_s16 = scalar_lea.hbm %s2270_s9, 3072 }
 0x85e   : > { %p1697_p8 = scmp.ne.s32.totalorder %s2214_s24, %s1696_s21  ;;  %p1701_p11 = scmp.lt.u32.totalorder %s2214_s24, %s2270_s9 }
 0x85f   : > { %p1702_p12 = scmp.lt.u32.totalorder %s1700_s16, %s1696_s21  ;;  %p1704_p0 = scmp.lt.u32.totalorder %s1696_s21, %s2214_s24 }
 0x860   : > { %p1698_p9 = pnand %p1697_p8, %p1885_p5 }
 0x861   : > { %p1703_p13 = por %p1702_p12, %p1701_p11 }
 0x862   : > { %p1699_p10 = pneg %p1698_p9 }
 0x863   : > { %p1705_p1 = por %p1704_p0, %p1703_p13 }
 0x865   : > { %p1706_p2 = pnand %p1705_p1, %p1699_p10 }
 0x867   : > { %1709 = shalt.err (!%p1706_p2)
}
 0x868   : > { %s1795_s25 = smov 512   ;;  %s1796_s27 = smov 32  }
 0x869   : > { %1550 = dma.vmem_to_hbm [thread:$0]  (%p1885_p5), %s2216_s29, 1536, %s2214_s24, %s2220_s26, %s1795_s25, %s1795_s25, %s1796_s27  }
 0x86a PF: > { %p1556_p3 = scmp.ge.s32.totalorder %s1764_s12, 2  ;;  %s1262_s13 = sand.u32 1, %s1752_s30  }
 0x86b   : > { %s1263_s22 = scalar_lea.sflag [#allocation3], %s1262_s13 }
 0x86c   : > { %p1553_p4 = pnand %p1556_p3, %p1889_p6 }
 0x86e   : > { %1747 = dma.done.wait (!%p1553_p4), %s1263_s22, 1536  }
 0x86f   : > { %1749 = vsyncadd (!%p1553_p4), %s1263_s22, 4294965760  ;;  %p19_p7 = scmp.ge.s32.totalorder %s1872_s15, 4   ;;  %s2282_s30 = smov %s1756_s10 }
 0x870   : > { %s2283_s10 = smov %s1760_s11  ;;  %s2284_s11 = smov %s1883_s18 }
 0x871   : > { %s2285_s12 = smov %s1872_s15  ;;  %21 = sbr.rel (!%p19_p7) target bundleno = 5 (0x5), region = 133 }
 0x878   :  { %1268 = vsyncpa [#allocation3], 1 }
 0x879   :  { %1270 = vsyncpa [#allocation3 + $0x1], 1 }

</bundles_post_ra>
